<compile_context>
chip_gen: v6e
topology: v6e:2x2x1
jax: 0.10.0
libtpu: 0.0.40
codegen_flags: <defaults>
</compile_context>

<pallas_src>
import functools

import jax
import jax.numpy as jnp
from jax.experimental import pallas as pl
from jax.experimental.pallas import tpu as pltpu


# --------------------------------------------------------------------------
# Kernel
# --------------------------------------------------------------------------
def actor_critic_kernel(x_ref, w1_ref, w2_ref, bias_ref, out_ref):
    """Fused actor+critic 2-layer MLP on one batch tile.

    x_ref    [TB, D]         state tile (compute dtype, f32 or bf16)
    w1_ref   [D, 2H]         concat(actor_w1, critic_w1)   (VMEM-resident)
    w2_ref   [2H, NOUT_PAD]  block-diag(actor_w2, critic_w2), zero-padded lanes
    bias_ref [2, W]  f32     row 0 = concat(b1_a, b1_c), row 1 = concat(b2_a, b2_c)
    out_ref  [TB, NOUT_PAD]  cols [:A] actor logits, [A:A+V] critic value
    """
    h2 = w1_ref.shape[1]
    nout = w2_ref.shape[1]

    x = x_ref[...]
    b = bias_ref[...]  # always f32: epilogue stays f32 (post-accumulation)

    # fused first layer: one MXU pass (contraction D, width 2H), f32 accumulate
    h = jnp.dot(x, w1_ref[...], preferred_element_type=jnp.float32)
    h = jnp.maximum(h + b[0:1, :h2], 0.0)

    # fused block-diagonal second layer: one MXU pass (contraction 2H, width 128)
    o = jnp.dot(h.astype(w2_ref.dtype), w2_ref[...],
                preferred_element_type=jnp.float32)
    o = o + b[1:2, :nout]  # padded bias lanes are zero

    out_ref[...] = o.astype(out_ref.dtype)


# --------------------------------------------------------------------------
# One-time parameter packing (hoisted out of the per-call path)
# --------------------------------------------------------------------------
def pack_params(params, compute_dtype=jnp.float32):
    """Pack actor+critic weights into the fused layout. Call once per update."""
    D, H = params["actor_w1"].shape
    A = params["actor_w2"].shape[1]
    V = params["critic_w2"].shape[1]
    H2 = 2 * H
    NOUT = A + V
    NOUT_PAD = pl.cdiv(NOUT, 128) * 128  # lane-dense output slab
    W = max(H2, NOUT_PAD)

    # fused first layer [D, 2H]
    w1cat = jnp.concatenate(
        [params["actor_w1"], params["critic_w1"]], axis=1).astype(compute_dtype)

    # fused block-diagonal second layer [2H, NOUT_PAD]
    w2blk = jnp.zeros((H2, NOUT_PAD), compute_dtype)
    w2blk = w2blk.at[:H, :A].set(params["actor_w2"].astype(compute_dtype))
    w2blk = w2blk.at[H:, A:NOUT].set(params["critic_w2"].astype(compute_dtype))

    # both bias rows packed into one [2, W] f32 array (epilogue stays f32)
    biases = jnp.zeros((2, W), jnp.float32)
    biases = biases.at[0, :H2].set(
        jnp.concatenate([params["actor_b1"], params["critic_b1"]],
                        axis=1)[0].astype(jnp.float32))
    biases = biases.at[1, :A].set(params["actor_b2"][0].astype(jnp.float32))
    biases = biases.at[1, A:NOUT].set(params["critic_b2"][0].astype(jnp.float32))

    return {
        "w1cat": w1cat, "w2blk": w2blk, "biases": biases,
        "A": A, "V": V, "NOUT": NOUT, "NOUT_PAD": NOUT_PAD,
    }


# --------------------------------------------------------------------------
# Forward
# --------------------------------------------------------------------------
def actor_critic_forward(state, packed, *, tb=512, out_dtype=None,
                         core_parallel=False):
    """Fused actor/critic forward pass.

    state:  [B, D]
    packed: output of pack_params()
    returns (action_pred [B, A], value_pred [B, 1]) in state.dtype
    """
    B, D = state.shape
    w1cat, w2blk, biases = packed["w1cat"], packed["w2blk"], packed["biases"]
    A, NOUT, NOUT_PAD = packed["A"], packed["NOUT"], packed["NOUT_PAD"]
    H2 = w1cat.shape[1]
    W = biases.shape[1]

    # compute dtype follows the packed weights (bf16 halves HBM traffic on
    # v6e/v7x; accumulation stays f32 inside the kernel either way).
    compute_dtype = w1cat.dtype
    out_dtype = compute_dtype if out_dtype is None else out_dtype
    state_c = state.astype(compute_dtype)

    # batch tile: multiple of 8 sublanes, clamped to the (rounded-up) batch
    tb = max(8, (int(tb) // 8) * 8)
    tb = min(tb, pl.cdiv(B, 8) * 8)
    grid = (pl.cdiv(B, tb),)  # no wrapper-side pad: Pallas masks the edge block

    batch_sem = pltpu.CORE_PARALLEL if core_parallel else "parallel"

    out = pl.pallas_call(
        actor_critic_kernel,
        out_shape=jax.ShapeDtypeStruct((B, NOUT_PAD), out_dtype),
        grid=grid,
        in_specs=[
            pl.BlockSpec((tb, D), lambda i: (i, 0)),          # state: batch-tiled
            pl.BlockSpec((D, H2), lambda i: (0, 0)),          # fused W1: resident
            pl.BlockSpec((H2, NOUT_PAD), lambda i: (0, 0)),   # fused W2: resident
            pl.BlockSpec((2, W), lambda i: (0, 0)),           # packed bias rows
        ],
        out_specs=pl.BlockSpec((tb, NOUT_PAD), lambda i: (i, 0)),
        compiler_params=pltpu.CompilerParams(
            dimension_semantics=(batch_sem,)),
    )(state_c, w1cat, w2blk, biases)

    action_pred = out[:, :A].astype(state.dtype)
    value_pred = out[:, A:NOUT].astype(state.dtype)
    return action_pred, value_pred


# --------------------------------------------------------------------------
# Synthetic parameters + pure-JAX reference
# --------------------------------------------------------------------------
def init_params(key, state_dim, hidden_dim, action_dim):
    ks = jax.random.split(key, 8)

    def lin(k, fan_in, fan_out):
        scale = 1.0 / jnp.sqrt(jnp.float32(fan_in))
        return jax.random.uniform(
            k, (fan_in, fan_out), jnp.float32, minval=-scale, maxval=scale)

    return {
        "actor_w1": lin(ks[0], state_dim, hidden_dim),
        "actor_b1": jax.random.uniform(ks[1], (1, hidden_dim), jnp.float32,
                                       minval=-0.1, maxval=0.1),
        "actor_w2": lin(ks[2], hidden_dim, action_dim),
        "actor_b2": jax.random.uniform(ks[3], (1, action_dim), jnp.float32,
                                       minval=-0.1, maxval=0.1),
        "critic_w1": lin(ks[4], state_dim, hidden_dim),
        "critic_b1": jax.random.uniform(ks[5], (1, hidden_dim), jnp.float32,
                                        minval=-0.1, maxval=0.1),
        "critic_w2": lin(ks[6], hidden_dim, 1),
        "critic_b2": jax.random.uniform(ks[7], (1, 1), jnp.float32,
                                        minval=-0.1, maxval=0.1),
    }


def reference_forward(state, params):
    ah = jnp.maximum(state @ params["actor_w1"] + params["actor_b1"], 0.0)
    a = ah @ params["actor_w2"] + params["actor_b2"]
    ch = jnp.maximum(state @ params["critic_w1"] + params["critic_b1"], 0.0)
    v = ch @ params["critic_w2"] + params["critic_b2"]
    return a, v


# --------------------------------------------------------------------------
if __name__ == "__main__":
    key = jax.random.PRNGKey(0)
    k_state, k_params = jax.random.split(key)

    B, D, H, A = 16, 32, 64, 16   # batch, state_dim, hidden, action_dim
    state = jax.random.normal(k_state, (B, D), jnp.float32)
    params = init_params(k_params, D, H, A)
    a_ref, v_ref = reference_forward(state, params)

    # --- exact f32 path (pack once, small tile -> exercises the 2-step grid) ---
    packed_f32 = pack_params(params, compute_dtype=jnp.float32)
    action_pred, value_pred = actor_critic_forward(state, packed_f32, tb=8)
    jax.block_until_ready((action_pred, value_pred))

    assert action_pred.shape == (B, A)
    assert value_pred.shape == (B, 1)
    assert jnp.allclose(action_pred, a_ref, atol=1e-5)
    assert jnp.allclose(value_pred, v_ref, atol=1e-5)

    # --- bf16-operand path (v6e/v7x HBM-traffic optimization), f32 accumulation ---
    packed_bf16 = pack_params(params, compute_dtype=jnp.bfloat16)
    a_bf, v_bf = actor_critic_forward(state, packed_bf16,
                                      tb=512, out_dtype=jnp.bfloat16)
    jax.block_until_ready((a_bf, v_bf))

    assert a_bf.shape == (B, A)
    assert v_bf.shape == (B, 1)
    assert jnp.allclose(a_bf, a_ref, atol=0.1, rtol=0.1)
    assert jnp.allclose(v_bf, v_ref, atol=0.1, rtol=0.1)

    print("KERNEL_OK")
</pallas_src>

<mosaic_0001>
module attributes {stable_mosaic.version = 11 : i64} {
  func.func @actor_critic_kernel(%arg0: i32, %arg1: memref<8x32xf32, #tpu.memory_space<vmem>>, %arg2: memref<32x128xf32, #tpu.memory_space<vmem>>, %arg3: memref<128x128xf32, #tpu.memory_space<vmem>>, %arg4: memref<2x128xf32, #tpu.memory_space<vmem>>, %arg5: memref<8x128xf32, #tpu.memory_space<vmem>>) attributes {dimension_semantics = [#tpu.dimension_semantics<parallel>], iteration_bounds = array<i64: 2>, scalar_prefetch = 0 : i64, scratch_operands = 0 : i64, tpu.core_type = #tpu.core_type<tc>, window_params = [{transform_indices = @transform_0, window_bounds = array<i64: 8, 32>}, {pipeline_mode = #tpu.pipeline_mode<synchronous>, transform_indices = @transform_1, window_bounds = array<i64: 32, 128>}, {pipeline_mode = #tpu.pipeline_mode<synchronous>, transform_indices = @transform_2, window_bounds = array<i64: 128, 128>}, {pipeline_mode = #tpu.pipeline_mode<synchronous>, transform_indices = @transform_3, window_bounds = array<i64: 2, 128>}, {transform_indices = @transform_4, window_bounds = array<i64: 8, 128>}]} {
    %c0 = arith.constant 0 : index
    %c0_0 = arith.constant 0 : index
    %0 = vector.load %arg1[%c0, %c0_0] : memref<8x32xf32, #tpu.memory_space<vmem>>, vector<8x32xf32>
    %c0_1 = arith.constant 0 : index
    %c0_2 = arith.constant 0 : index
    %1 = vector.load %arg4[%c0_1, %c0_2] : memref<2x128xf32, #tpu.memory_space<vmem>>, vector<2x128xf32>
    %c0_3 = arith.constant 0 : index
    %c0_4 = arith.constant 0 : index
    %2 = vector.load %arg2[%c0_3, %c0_4] : memref<32x128xf32, #tpu.memory_space<vmem>>, vector<32x128xf32>
    %cst = arith.constant dense<0.000000e+00> : vector<8x128xf32>
    %3 = tpu.matmul %0, %2, %cst {dimension_numbers = #tpu.dot_dimension_numbers<[1], [0], [0], [1], [0, 0, 1, 1], [], []>} : vector<8x32xf32>, vector<32x128xf32>, vector<8x128xf32> -> vector<8x128xf32>
    %4 = vector.extract_strided_slice %1 {offsets = [0, 0], sizes = [1, 128], strides = [1, 1]} : vector<2x128xf32> to vector<1x128xf32>
    %5 = vector.broadcast %4 : vector<1x128xf32> to vector<8x128xf32>
    %6 = arith.addf %3, %5 : vector<8x128xf32>
    %cst_5 = arith.constant 0.000000e+00 : f32
    %7 = vector.broadcast %cst_5 : f32 to vector<8x128xf32>
    %8 = arith.maximumf %6, %7 : vector<8x128xf32>
    %c0_6 = arith.constant 0 : index
    %c0_7 = arith.constant 0 : index
    %9 = vector.load %arg3[%c0_6, %c0_7] : memref<128x128xf32, #tpu.memory_space<vmem>>, vector<128x128xf32>
    %cst_8 = arith.constant dense<0.000000e+00> : vector<8x128xf32>
    %10 = tpu.matmul %8, %9, %cst_8 {dimension_numbers = #tpu.dot_dimension_numbers<[1], [0], [0], [1], [0, 0, 1, 1], [], []>} : vector<8x128xf32>, vector<128x128xf32>, vector<8x128xf32> -> vector<8x128xf32>
    %11 = vector.extract_strided_slice %1 {offsets = [1, 0], sizes = [1, 128], strides = [1, 1]} : vector<2x128xf32> to vector<1x128xf32>
    %12 = vector.broadcast %11 : vector<1x128xf32> to vector<8x128xf32>
    %13 = arith.addf %10, %12 : vector<8x128xf32>
    %c0_9 = arith.constant 0 : index
    %c0_10 = arith.constant 0 : index
    %14 = vector.load %arg5[%c0_9, %c0_10] : memref<8x128xf32, #tpu.memory_space<vmem>>, vector<8x128xf32>
    tpu.vector_store %arg5[%c0_9, %c0_10], %13 {strides = array<i32>} : memref<8x128xf32, #tpu.memory_space<vmem>>, vector<8x128xf32>,
    return
  }
  func.func @transform_0(%arg0: i32) -> (i32, i32) {
    %c0_i32 = arith.constant 0 : i32
    %c0_i32_0 = arith.constant 0 : i32
    return %arg0, %c0_i32 : i32, i32
  }
  func.func @transform_1(%arg0: i32) -> (i32, i32) {
    %c0_i32 = arith.constant 0 : i32
    %c0_i32_0 = arith.constant 0 : i32
    %c0_i32_1 = arith.constant 0 : i32
    return %c0_i32, %c0_i32_0 : i32, i32
  }
  func.func @transform_2(%arg0: i32) -> (i32, i32) {
    %c0_i32 = arith.constant 0 : i32
    %c0_i32_0 = arith.constant 0 : i32
    %c0_i32_1 = arith.constant 0 : i32
    return %c0_i32, %c0_i32_0 : i32, i32
  }
  func.func @transform_3(%arg0: i32) -> (i32, i32) {
    %c0_i32 = arith.constant 0 : i32
    %c0_i32_0 = arith.constant 0 : i32
    %c0_i32_1 = arith.constant 0 : i32
    return %c0_i32, %c0_i32_0 : i32, i32
  }
  func.func @transform_4(%arg0: i32) -> (i32, i32) {
    %c0_i32 = arith.constant 0 : i32
    %c0_i32_0 = arith.constant 0 : i32
    return %arg0, %c0_i32 : i32, i32
  }
}

</mosaic_0001>

<bundles_post_ra>
// kernel: tpu_custom_call.1
= control target key start
LH: loop header
LB: loop body
LE: loop exit
PB: predicated region body
PF: predicated region fallthrough
CT: control target
= control target key end

     0   :  { %9 = vsyncpa [#allocation3], 0  ;;  %s1060_s0 = inlined_call_operand.hbm [shape: f32[16,32], index: 0, kind: input, shape index: {}]   ;;  %s1061_s1 = inlined_call_operand.hbm [shape: f32[32,128], index: 1, kind: input, shape index: {}]   ;;  %s1062_s2 = inlined_call_operand.hbm [shape: f32[128,128], index: 2, kind: input, shape index: {}]   ;;  %s1063_s3 = inlined_call_operand.vmem [shape: f32[2,128], index: 3, kind: input, shape index: {}]   ;;  %s1064_s4 = inlined_call_operand.hbm [shape: f32[16,128], index: 4, kind: output, shape index: {}]  }
   0x1   :  { %11 = vsyncpa [#allocation3 + $0x1], 0 }
   0x2   :  { %12 = vsyncpa [#allocation6], 0 }
   0x3   :  { %13 = vsyncpa [#allocation4], 0 }
   0x4   :  { %15 = vsyncpa [#allocation4 + $0x1], 0  ;;  %s860_s15 = smov 0   ;;  %s862_s16 = smov 0  }
   0x5   :  { %s864_s17 = smov 0   ;;  %s866_s18 = smov 0  }
   0x6 LB: > { %s881_s19 = sadd.s32 4294967295, %s825_s18   ;;  %s521_s20 = sadd.s32 4294967294, %s825_s18   ;;  %s825_s18 = sphi %s866_s18, %s1086_s18   ;;  %s821_s17 = sphi %s864_s17, %s1085_s17   ;;  %s817_s16 = sphi %s862_s16, %s1084_s16   ;;  %s813_s15 = sphi %s860_s15, %s1083_s15  }
   0x7   : > { %p41_p0 = scmp.ne.s32.totalorder %s817_s16, %s813_s15  ;;  %p1065_p1 = scmp.eq.s32.totalorder %s881_s19, 0 }
   0x8   : > { %p134_p3 = scmp.eq.s32.totalorder %s521_s20, 1  ;;  %p522_p5 = scmp.ge.s32.totalorder %s825_s18, 1 }
   0x9   : > { %p890_p4 = por %p1065_p1, %p41_p0  ;;  %p141_p7 = scmp.lt.s32.totalorder %s825_s18, 3 }
   0xa   : > { %p895_p6 = por %p134_p3, %p41_p0  ;;  %s827_s24 = smov [#allocation5]  }
   0xb   : > { %s1069_s21 = scalar_select %p890_p4, 1, 0 }
   0xc   : > { %s1070_s22 = scalar_select %p895_p6, 1, 0 }
   0xd   : > { %p900_p8 = pnand %p522_p5, %p141_p7  ;;  %s153_s25 = sshll.u32 %s827_s24, 4  ;;  %s154_s25 = int_to_ptr.vmem [resolvable:$true] %s153_s25 }
   0xe   : > { %s828_s27 = smov [#allocation7]   ;;  %s688_s29 = scalar_lea.vmem %s154_s25, 512 }
   0xf   : > { %s1071_s23 = scalar_select %p900_p8, 1, 0 }
  0x10   : > { %p618_p9 = pneg %p900_p8  ;;  %s166_s28 = sshll.u32 %s828_s27, 4  ;;  %s167_s28 = int_to_ptr.vmem [resolvable:$true] %s166_s28 }
  0x11   : > { %p689_p13 = scmp.ne.s32.totalorder %s154_s25, %s688_s29  ;;  %p696_p5 = scmp.lt.s32.totalorder %s154_s25, %s154_s25 }
  0x12   : > { %p909_p11 = pnand %p618_p9, %p1065_p1  ;;  %p697_p7 = scmp.lt.s32.totalorder %s688_s29, %s688_s29 }
  0x14   : > { %p679_p12 = pneg %p909_p11  ;;  %p698_p10 = por %p697_p7, %p696_p5 }
  0x16   : > { %p691_p0 = pnand %p689_p13, %p679_p12 }
  0x18   : > { %p692_p3 = pneg %p691_p0 }
  0x1a   : > { %p699_p9 = pnand %p698_p10, %p692_p3 }
  0x1c   : > { %702 = shalt.err (!%p699_p9)
}
  0x1d   : > { %s829_s30 = smov 128   ;;  %s830_s5 = smov 8  }
  0x1e   : > { %621 = dma.hbm_to_vmem [thread:$0]  (!%p909_p11), %s1061_s1, 512, %s154_s25, [#allocation6], %s829_s30, %s829_s30, %s830_s5  }
  0x1f   : > { %s714_s8 = scalar_lea.vmem %s167_s28, 2048  ;;  %p722_p2 = scmp.lt.s32.totalorder %s167_s28, %s167_s28 }
  0x20   : > { %p715_p1 = scmp.ne.s32.totalorder %s167_s28, %s714_s8  ;;  %p723_p6 = scmp.lt.s32.totalorder %s714_s8, %s714_s8 }
  0x22   : > { %p717_p13 = pnand %p715_p1, %p679_p12  ;;  %p724_p5 = por %p723_p6, %p722_p2 }
  0x24   : > { %p718_p0 = pneg %p717_p13 }
  0x26   : > { %p725_p10 = pnand %p724_p5, %p718_p0 }
  0x28   : > { %728 = shalt.err (!%p725_p10)
}
  0x29   : > { %624 = dma.hbm_to_vmem [thread:$0]  (!%p909_p11), %s1062_s2, 2048, %s167_s28, [#allocation6], %s829_s30, %s829_s30, %s830_s5  }
  0x2a   : > { %s932_s11 = sadd.s32 1, %s825_s18   ;;  %s28_s12 = sadd.s32 1, %s821_s17 }
  0x2b   : > { %s25_s13 = ssub.s32 %s825_s18, %s932_s11  ;;  %p35_p1 = scmp.ne.s32.totalorder %s821_s17, %s817_s16 }
  0x2c   : > { %p26_p2 = scmp.eq.s32.totalorder %s25_s13, 0  ;;  %p36_p6 = scmp.eq.s32.totalorder %s825_s18, 0 }
  0x2d   : > { %p1073_p12 = scmp.eq.s32.totalorder %s881_s19, 1  ;;  %p635_p7 = scmp.lt.s32.totalorder %s825_s18, 2 }
  0x2e   : > { %s948_s20 = scalar_select %p26_p2, %s821_s17, %s28_s12  }
  0x2f   : > { %p942_p3 = por %p1073_p12, %p35_p1  ;;  %p37_p9 = por %p36_p6, %p35_p1 }
  0x30   : > { %s183_s24 = sand.u32 1, %s821_s17   ;;  %s527_s26 = sshll.u32 %s825_s18, 7 }
  0x31   : > { %s1074_s14 = scalar_select %p942_p3, 1, 0 }
  0x32   : > { %s526_s25 = sshll.u32 %s183_s24, 3  ;;  %s955_s29 = scalar_lea.hbm %s1060_s0, %s527_s26 }
  0x33   : > { %s187_s30 = scalar_lea.vmem [#allocation2], %s526_s25  ;;  %p957_p11 = pnand %p635_p7, %p37_p9 }
  0x34   : > { %s194_s5 = sshll.u32 %s187_s30, 4  ;;  %s184_s7 = scalar_lea.sflag [#allocation3], %s183_s24  ;;  %s195_s5 = int_to_ptr.vmem [resolvable:$true] %s194_s5 }
  0x35   : > { %s729_s8 = scalar_lea.hbm %s955_s29, 128  ;;  %p731_p0 = pneg %p957_p11 }
  0x36   : > { %p730_p13 = scmp.ne.s32.totalorder %s955_s29, %s729_s8  ;;  %s734_s12 = scalar_lea.hbm %s1060_s0, 256 }
  0x37   : > { %p735_p1 = scmp.lt.s32.totalorder %s955_s29, %s1060_s0  ;;  %p736_p2 = scmp.lt.s32.totalorder %s734_s12, %s729_s8 }
  0x38   : > { %p732_p5 = pnand %p731_p0, %p730_p13 }
  0x39   : > { %p737_p6 = por %p736_p2, %p735_p1 }
  0x3a   : > { %p733_p10 = pneg %p732_p5 }
  0x3c   : > { %p738_p12 = pnand %p737_p6, %p733_p10 }
  0x3e   : > { %741 = shalt.err (!%p738_p12)
}
  0x3f   : > { %s742_s26 = scalar_lea.vmem %s195_s5, 128  ;;  %s831_s24 = smov [#allocation2]  }
  0x40   : > { %p743_p7 = scmp.ne.s32.totalorder %s195_s5, %s742_s26  ;;  %s747_s27 = sshll.u32 %s831_s24, 4  ;;  %s748_s27 = int_to_ptr.vmem [resolvable:$false] %s747_s27 }
  0x41   : > { %s749_s28 = scalar_lea.vmem %s748_s27, 256  ;;  %p750_p13 = scmp.lt.s32.totalorder %s195_s5, %s748_s27 }
  0x42   : > { %p745_p9 = pnand %p743_p7, %p731_p0  ;;  %p751_p5 = scmp.lt.s32.totalorder %s749_s28, %s742_s26 }
  0x44   : > { %p746_p3 = pneg %p745_p9  ;;  %p752_p4 = por %p751_p5, %p750_p13 }
  0x46   : > { %p753_p8 = pnand %p752_p4, %p746_p3 }
  0x48   : > { %756 = shalt.err (!%p753_p8)
}
  0x49   : > { %628 = dma.hbm_to_vmem [thread:$0]  (!%p957_p11), %s955_s29, 128, %s195_s5, %s184_s7  }
  0x4a   : > { %p1076_p10 = scmp.ne.s32.totalorder %s1071_s23, 0 }
  0x4b   : > { %s978_s30 = sand.u32 (!%p1076_p10), 1, %s817_s16   ;;  %p1077_p4 = scmp.ne.s32.totalorder (!%p1076_p10), %s1069_s21, 0 }
  0x4c   : > { %203 = sbr.rel (%p1076_p10) target bundleno = 500 (0x1f4), region = 36  ;;  %s529_s8 = sshll.u32 (!%p1076_p10), %s978_s30, 3 }
  0x4d   : > { %s206_s9 = scalar_lea.sflag (!%p1076_p10), [#allocation3], %s978_s30  ;;  %s209_s10 = scalar_lea.vmem (!%p1076_p10), [#allocation2], %s529_s8 }
  0x51   : > { %800 = dma.done.wait (%p1077_p4), %s206_s9, 128  }
  0x52   : > { %802 = vsyncadd (%p1077_p4), %s206_s9, 4294967168  ;;  %p1078_p8 = scmp.eq.s32.totalorder %s881_s19, 0 }
  0x54   : > { %804 = dma.done.wait (%p1078_p8), [#allocation6], 2560   ;;  %p1079_p3 = pmov %p1078_p8 }
  0x55   : > { %v832_v0 = vmov 0.0   ;;  %vm833_vm0 = vmmov 0   ;;  %v247_v1 = vld [vmem:[#allocation5 + $0x18] sm:$0xff]  ;;  %v246_v2 = vld [vmem:[#allocation5 + $0x10] sm:$0xff]  ;;  %v245_v4 = vld [vmem:[#allocation5 + $0x8] sm:$0xff]  ;;  %vm252_vm1 = vcmask 261120   ;;  %v248_v22 = vlaneseq }
  0x56   : > { %806 = vsyncadd (%p1079_p3), [#allocation6], 4294964736  ;;  %560 = vmatprep.subr.mxu0 %v832_v0  ;;  %568 = vmatprep.mubr.msk.f32.mxu0 %vm833_vm0, %v832_v0  ;;  %v342_v3 = vld [vmem:[#allocation7 + $0x78] sm:$0xff]  ;;  %v341_v5 = vld [vmem:[#allocation7 + $0x70] sm:$0xff]  ;;  %s535_s29 = sshll.u32 %s881_s19, 7  ;;  %s241_s5 = scalar_lea.vmem [#allocation8], %s529_s8 }
  0x57   : > { %571 = vmatprep.subr.mxu1 %v832_v0  ;;  %603 = vmatprep.mubr.msk.f32.mxu1 %vm833_vm0, %v832_v0  ;;  %v340_v6 = vld [vmem:[#allocation7 + $0x68] sm:$0xff]  ;;  %v244_v7 = vld [vmem:[#allocation5] sm:$0xff]  ;;  %v242_v8 = vld [vmem:[%s209_s10] sm:$0xff]  ;;  %v249_v23 = vshrl.u32 %v248_v22, 7  ;;  %s432_s6 = sshll.u32 %s241_s5, 4  ;;  %s1023_s13 = scalar_lea.hbm %s1064_s4, %s535_s29  ;;  %s433_s6 = int_to_ptr.vmem [resolvable:$true] %s432_s6 }
  0x58   : > { %561 = vmatpush3.msra.mxu0 %v247_v1  ;;  %572 = vmatpush3.msra.mxu1 %v342_v3  ;;  %v339_v9 = vld [vmem:[#allocation7 + $0x60] sm:$0xff]  ;;  %v338_v10 = vld [vmem:[#allocation7 + $0x58] sm:$0xff]  ;;  %v337_v11 = vld [vmem:[#allocation7 + $0x50] sm:$0xff]  ;;  %s419_s25 = scalar_lea.sflag [#allocation4], %s978_s30  ;;  %s757_s26 = scalar_lea.vmem %s433_s6, 128 }
  0x59   : > { %562 = vmatprep.subr.mxu0 %v832_v0  ;;  %573 = vmatprep.subr.mxu1 %v832_v0  ;;  %v336_v12 = vld [vmem:[#allocation7 + $0x48] sm:$0xff]  ;;  %v335_v13 = vld [vmem:[#allocation7 + $0x40] sm:$0xff]  ;;  %v334_v14 = vld [vmem:[#allocation7 + $0x38] sm:$0xff]  ;;  %v250_v24 = vsub.s32 0, %v249_v23  ;;  %v345_v31 = vsub.s32 1, %v249_v23  ;;  %p758_p11 = scmp.ne.s32.totalorder %s433_s6, %s757_s26  ;;  %p1080_p0 = scmp.ne.s32.totalorder %s1074_s14, 0 }
  0x5a   : > { %563 = vmatpush3.msra.mxu0 %v246_v2  ;;  %574 = vmatpush3.msra.mxu1 %v341_v5  ;;  %v333_v15 = vld [vmem:[#allocation7 + $0x30] sm:$0xff]  ;;  %v332_v16 = vld [vmem:[#allocation7 + $0x28] sm:$0xff]  ;;  %v331_v17 = vld [vmem:[#allocation7 + $0x20] sm:$0xff]  ;;  %s834_s19 = smov [#allocation8]  }
  0x5b   : > { %564 = vmatprep.subr.mxu0 %v832_v0  ;;  %575 = vmatprep.subr.mxu1 %v832_v0  ;;  %v330_v18 = vld [vmem:[#allocation7 + $0x18] sm:$0xff]  ;;  %v329_v19 = vld [vmem:[#allocation7 + $0x10] sm:$0xff]  ;;  %v328_v20 = vld [vmem:[#allocation7 + $0x8] sm:$0xff]  ;;  %p759_p1 = pnand %p758_p11, %p1080_p0  ;;  %s761_s24 = sshll.u32 %s834_s19, 4  ;;  %s762_s24 = int_to_ptr.vmem [resolvable:$false] %s761_s24 }
  0x5c   : > { %565 = vmatpush3.msra.mxu0 %v245_v4  ;;  %576 = vmatpush3.msra.mxu1 %v340_v6  ;;  %v327_v21 = vld [vmem:[#allocation7] sm:$0xff]  ;;  %v243_v25 = vld [vmem:[%s1063_s3] sm:$0x3]  ;;  %s763_s27 = scalar_lea.vmem %s762_s24, 256  ;;  %p764_p6 = scmp.lt.s32.totalorder %s433_s6, %s762_s24 }
  0x5d   : > { %566 = vmatprep.subr.mxu0 %v832_v0  ;;  %577 = vmatprep.subr.mxu1 %v832_v0  ;;  %v251_v26 = vrot.slane %v243_v25, %v250_v24  ;;  %v346_v32 = vrot.slane %v243_v25, %v345_v31  ;;  %p760_p2 = pneg %p759_p1  ;;  %p765_p12 = scmp.lt.s32.totalorder %s763_s27, %s757_s26 }
  0x5e   : > { %567 = vmatpush3.msra.mxu0 %v244_v7  ;;  %578 = vmatpush3.msra.mxu1 %v339_v9 }
  0x5f   : > { %569 = vmatmul.mubr.msk.f32.vlgmr.msra.gmra.mxu0 %vm252_vm1, %v242_v8  ;;  %579 = vmatprep.subr.mxu1 %v832_v0  ;;  %p766_p7 = por %p765_p12, %p764_p6 }
  0x60   : > { %580 = vmatpush3.msra.mxu1 %v338_v10 }
  0x61   : > { %581 = vmatprep.subr.mxu1 %v832_v0  ;;  %p767_p9 = pnand %p766_p7, %p760_p2 }
  0x62   : > { %582 = vmatpush3.msra.mxu1 %v337_v11 }
  0x63   : > { %583 = vmatprep.subr.mxu1 %v832_v0 }
  0x64   : > { %584 = vmatpush3.msra.mxu1 %v336_v12 }
  0x65   : > { %585 = vmatprep.subr.mxu1 %v832_v0 }
  0x66   : > { %586 = vmatpush3.msra.mxu1 %v335_v13 }
  0x67   : > { %587 = vmatprep.subr.mxu1 %v832_v0 }
  0x68   : > { %588 = vmatpush3.msra.mxu1 %v334_v14 }
  0x69   : > { %589 = vmatprep.subr.mxu1 %v832_v0 }
  0x6a   : > { %590 = vmatpush3.msra.mxu1 %v333_v15 }
  0x6b   : > { %591 = vmatprep.subr.mxu1 %v832_v0 }
  0x6c   : > { %592 = vmatpush3.msra.mxu1 %v332_v16 }
  0x6d   : > { %593 = vmatprep.subr.mxu1 %v832_v0 }
  0x6e   : > { %594 = vmatpush3.msra.mxu1 %v331_v17 }
  0x6f   : > { %595 = vmatprep.subr.mxu1 %v832_v0 }
  0x70   : > { %596 = vmatpush3.msra.mxu1 %v330_v18 }
  0x71   : > { %597 = vmatprep.subr.mxu1 %v832_v0 }
  0x72   : > { %598 = vmatpush3.msra.mxu1 %v329_v19 }
  0x73   : > { %599 = vmatprep.subr.mxu1 %v832_v0 }
  0x74   : > { %600 = vmatpush3.msra.mxu1 %v328_v20 }
  0x75   : > { %601 = vmatprep.subr.mxu1 %v832_v0 }
  0x76   : > { %602 = vmatpush3.msra.mxu1 %v327_v21 }
 0x11f   : > { %v322_v27 = vpop.f32.mrf.mxu0 }
 0x120   : > { %v323_v28 = vadd.f32 %v322_v27, %v251_v26 }
 0x121   : > { %v570_v29 = vpop.f32.mrf.mxu0 }
 0x122   : > { %v326_v30 = vmax.f32 %v323_v28, 0.0 }
 0x124   : > { %604 = vmatmul.mubr.f32.vlgmr.msra.gmra.mxu1 %v326_v30 }
 0x1e4   : > { %v413_v33 = vpop.f32.mrf.mxu1 }
 0x1e5   : > { %v414_v34 = vadd.f32 %v413_v33, %v346_v32 }
 0x1e6   : > { %v605_v35 = vpop.f32.mrf.mxu1 }
 0x1e7   : > { %417 = vst [vmem:[%s241_s5] sm:$0xff] %v414_v34 }
 0x1e8   : > { %770 = shalt.err (!%p767_p9)
}
 0x1e9   : > { %s771_s28 = scalar_lea.hbm %s1023_s13, 128  ;;  %s775_s9 = scalar_lea.hbm %s1064_s4, 256 }
 0x1ea   : > { %p772_p13 = scmp.ne.s32.totalorder %s1023_s13, %s771_s28  ;;  %p776_p4 = scmp.lt.s32.totalorder %s1023_s13, %s1064_s4 }
 0x1eb   : > { %p777_p8 = scmp.lt.s32.totalorder %s775_s9, %s771_s28 }
 0x1ec   : > { %p773_p5 = pnand %p772_p13, %p1080_p0 }
 0x1ed   : > { %p778_p3 = por %p777_p8, %p776_p4 }
 0x1ee   : > { %p774_p10 = pneg %p773_p5 }
 0x1f0   : > { %p779_p11 = pnand %p778_p3, %p774_p10 }
 0x1f2   : > { %782 = shalt.err (!%p779_p11)
}
 0x1f3   : > { %616 = dma.vmem_to_hbm [thread:$0]  (%p1080_p0), %s433_s6, 128, %s1023_s13, %s419_s25  }
 0x1f4 PF: > { %s444_s23 = sand.u32 1, %s813_s15   ;;  %p1081_p1 = scmp.ne.s32.totalorder %s1070_s22, 0 }
 0x1f5   : > { %p1082_p2 = scmp.ge.s32.totalorder %s825_s18, 2  ;;  %s445_s29 = scalar_lea.sflag [#allocation4], %s444_s23 }
 0x1f7   : > { %p630_p6 = pnand %p1082_p2, %p1081_p1 }
 0x1f9   : > { %p631_p12 = pneg %p630_p6 }
 0x1fb   : > { %808 = dma.done.wait (%p631_p12), %s445_s29, 128  }
 0x1fc   : > { %810 = vsyncadd (%p631_p12), %s445_s29, 4294967168  ;;  %p18_p7 = scmp.ge.s32.totalorder %s932_s11, 4   ;;  %s1083_s15 = smov %s817_s16 }
 0x1fd   : > { %s1084_s16 = smov %s821_s17  ;;  %s1085_s17 = smov %s948_s20 }
 0x1fe   : > { %s1086_s18 = smov %s932_s11  ;;  %20 = sbr.rel (!%p18_p7) target bundleno = 6 (0x6), region = 89 }
 0x203   :  { %450 = vsyncpa [#allocation3], 1 }
 0x204   :  { %452 = vsyncpa [#allocation3 + $0x1], 1 }
 0x205   :  { %453 = vsyncpa [#allocation6], 1 }
 0x206   :  { %454 = vsyncpa [#allocation4], 1 }
 0x207   :  { %456 = vsyncpa [#allocation4 + $0x1], 1 }

</bundles_post_ra>
